<compile_context>
chip_gen: v5e
topology: v5e:2x2
jax: 0.10.0
libtpu: 0.0.40
codegen_flags: <defaults>
</compile_context>

<pallas_src>
import functools

import numpy as np
import jax
import jax.numpy as jnp
from jax import lax
from jax.experimental import pallas as pl
from jax.experimental.pallas import tpu as pltpu

LOG2PI = float(np.log(2.0 * np.pi))


def _round_up(a, b):
    return (a + b - 1) // b * b


def _split2d_logp_kernel(z1p_ref, z2_ref, w_ref, bias_ref, scale_ref, mask_ref,
                         out_ref, tap_ref, *,
                         block_b, ch, wp, chunk, n_chunks, window, c_rows):
    """One grid step == `block_b` batch samples.

    z1p_ref  (Bb, Ch, P)        bf16  zero-padded z1 flattened row-major over (H+2, W+2),
                                      zero-extended so every chunk window is in range
    z2_ref   (Bb, Ch, Lp)       f32   z2 in the same padded-flat column layout (pad cols 0)
    w_ref    (2Ch, 9Ch)         f32   fused conv taps, out-channels permuted (means|logs)
    bias_ref (2Ch, 1)           f32   conv bias (permuted)
    scale_ref(2Ch, 1)           f32   exp(3*logs_param) (permuted)
    mask_ref (1, Lp)            f32   1.0 at valid spatial columns, 0.0 at pad columns
    out_ref  (Bb, c_rows, 128)  f32   lane-dense per-sample partials of logs + 0.5*d^2
    tap_ref  (9Ch, chunk)       f32   VMEM scratch: stacked conv-tap slab
    """
    w = w_ref[...]
    bias = bias_ref[...]
    scale = scale_ref[...]

    for s in range(block_b):                       # samples within the block
        acc = jnp.zeros((ch, 128), jnp.float32)    # lane-dense partial sums
        for ci in range(n_chunks):                 # 128-aligned lane chunks
            c0 = ci * chunk
            # full-width, lane-aligned window covering chunk + 3x3 tap overhang
            z1w = z1p_ref[s, :, c0:c0 + window].astype(jnp.float32)      # (Ch, window)

            # stack the 9 shifted tap slices into the (9Ch, chunk) VMEM slab
            for t in range(9):
                ky, kx = divmod(t, 3)
                off = ky * wp + kx
                tap_ref[t * ch:(t + 1) * ch, :] = z1w[:, off:off + chunk]

            # fused 3x3 conv: ONE MXU matmul with K = 9*Ch, f32 accumulate
            h = jnp.dot(w, tap_ref[...], preferred_element_type=jnp.float32)  # (2Ch, chunk)
            h = (h + bias) * scale            # Conv2dZeros scale applied in f32 post-matmul

            mean = h[:ch]                     # 'cross' split -> contiguous sublane split
            logs = h[ch:]
            z2c = z2_ref[s, :, c0:c0 + chunk].astype(jnp.float32)
            m = mask_ref[:, c0:c0 + chunk]    # (1, chunk), broadcast over channels

            logs_m = logs * m                 # mask BEFORE exp -> pad cols can't inf/NaN
            d = (z2c - mean) * m * jnp.exp(-logs_m)
            term = logs_m + 0.5 * d * d       # (Ch, chunk);  ll = -(term) - 0.5*ln(2*pi)

            # fold lanes into the 128-wide partial-sum register: VPU adds only
            for j in range(chunk // 128):
                acc = acc + term[:, j * 128:(j + 1) * 128]

        out_ref[s] = jnp.zeros((c_rows, 128), jnp.float32)
        out_ref[s, :ch, :] = acc


def split2d_forward(x, weight, conv_bias, logs_param, logdet=0.0,
                    logscale_factor=3, block_b=None, z2_bf16=False):
    """x: NCHW (B,C,H,W). weight: (C, C//2, 3, 3). conv_bias: (C,). logs_param: (C,1,1)."""
    B, C, H, W = x.shape
    Ch = C // 2
    Wp = W + 2
    L = H * Wp                                       # conv-output flat length (per sample)

    chunk = min(512, _round_up(L, 128))              # lane-chunk width (multiple of 128)
    Lp = _round_up(L, chunk)                         # padded flat length of z2 / mask
    n_chunks = Lp // chunk
    window = _round_up(chunk + 2 * Wp + 2, 128)      # chunk + 3x3 tap overhang, lane aligned
    P = Lp - chunk + window                          # per-sample padded z1 flat length (x128)
    Cr = _round_up(Ch, 8)                            # sublane rows of the partial-sum output

    z1 = x[:, :Ch]                                   # returned unchanged
    z2 = x[:, Ch:]

    # --- layout glue (no 9x im2col inflation in HBM) ---
    z1p = jnp.pad(z1, ((0, 0), (0, 0), (1, 1), (1, 1))).reshape(B, Ch, (H + 2) * Wp)
    z1p = jnp.pad(z1p, ((0, 0), (0, 0), (0, P - (H + 2) * Wp)))              # (B, Ch, P)
    z2p = jnp.pad(z2, ((0, 0), (0, 0), (0, 0), (0, 2))).reshape(B, Ch, L)
    z2p = jnp.pad(z2p, ((0, 0), (0, 0), (0, Lp - L)))                        # (B, Ch, Lp)
    cols = np.arange(Lp)
    mask = jnp.asarray(((cols < L) & (cols % Wp < W)).astype(np.float32)).reshape(1, Lp)

    # output-channel permutation: evens -> means, odds -> logs ('cross' split)
    perm = np.concatenate([np.arange(0, C, 2), np.arange(1, C, 2)])
    # fused tap weights: w_fused[c, (ky*3+kx)*Ch + ic] = weight[perm[c], ic, ky, kx]
    w_fused = jnp.transpose(weight[perm], (0, 2, 3, 1)).reshape(C, 9 * Ch)   # (2Ch, 9Ch)
    bias_p = conv_bias[perm].reshape(C, 1)                                   # (2Ch, 1)
    scale_p = jnp.exp(logs_param.reshape(C) * logscale_factor)[perm].reshape(C, 1)

    z2_dtype = jnp.bfloat16 if z2_bf16 else jnp.float32

    # --- samples per grid step: amortize per-step overhead, keep double-buffered
    # inputs well under v7x's 64 MiB VMEM, and keep the grid >= 2 (ideally >= 4)
    # steps so both v7x TensorCores are used. ---
    per_sample = Ch * P * 2 + Ch * Lp * jnp.dtype(z2_dtype).itemsize
    if block_b is None:
        cap = max(1, (12 * 1024 * 1024) // max(per_sample, 1))
        grid_min = min(B, 4) if B > 1 else 1
        block_b = 1
        for d in range(1, B + 1):
            if B % d == 0 and d <= cap and B // d >= grid_min:
                block_b = d
    assert B % block_b == 0, "block_b must divide the batch"

    kernel = functools.partial(
        _split2d_logp_kernel, block_b=block_b, ch=Ch, wp=Wp,
        chunk=chunk, n_chunks=n_chunks, window=window, c_rows=Cr)

    flops = B * (2 * C * 9 * Ch * Lp + 10 * Ch * Lp)
    bytes_accessed = (B * Ch * P * 2 + B * Ch * Lp * jnp.dtype(z2_dtype).itemsize
                      + C * 9 * Ch * 4 + 2 * C * 4 + Lp * 4 + B * Cr * 128 * 4)
    cost = pl.CostEstimate(flops=flops, transcendentals=B * Ch * Lp,
                           bytes_accessed=bytes_accessed)

    out = pl.pallas_call(
        kernel,
        out_shape=jax.ShapeDtypeStruct((B, Cr, 128), jnp.float32),
        grid=(B // block_b,),
        in_specs=[
            pl.BlockSpec((block_b, Ch, P), lambda g: (g, 0, 0)),   # z1 padded-flat (bf16)
            pl.BlockSpec((block_b, Ch, Lp), lambda g: (g, 0, 0)),  # z2 padded-flat
            pl.BlockSpec((C, 9 * Ch), lambda g: (0, 0)),           # fused conv taps (f32)
            pl.BlockSpec((C, 1), lambda g: (0, 0)),                # bias (f32)
            pl.BlockSpec((C, 1), lambda g: (0, 0)),                # exp(3*logs_param) (f32)
            pl.BlockSpec((1, Lp), lambda g: (0, 0)),               # valid-column mask
        ],
        out_specs=pl.BlockSpec((block_b, Cr, 128), lambda g: (g, 0, 0)),
        scratch_shapes=[pltpu.VMEM((9 * Ch, chunk), jnp.float32)],  # tap slab
        compiler_params=pltpu.CompilerParams(
            dimension_semantics=("parallel",),
            vmem_limit_bytes=32 * 1024 * 1024),
        cost_estimate=cost,
    )(z1p.astype(jnp.bfloat16), z2p.astype(z2_dtype),
      w_fused.astype(jnp.float32), bias_p.astype(jnp.float32),
      scale_p.astype(jnp.float32), mask)

    # finish the reduction in the wrapper (lane-dense partials -> per-sample scalar)
    logp = -jnp.sum(out, axis=(1, 2)) - 0.5 * LOG2PI * (Ch * H * W)
    return z1, logp + logdet
    # TODO(synk): reverse=True branch (GaussianDiag.sample via torch.normal) not implemented.


def reference_forward(x, weight, conv_bias, logs_param, logdet=0.0,
                      logscale_factor=3):
    """Pure-JAX f32 reference matching the PyTorch forward (reverse=False)."""
    B, C, H, W = x.shape
    Ch = C // 2
    z1, z2 = x[:, :Ch], x[:, Ch:]
    h = lax.conv_general_dilated(z1, weight, window_strides=(1, 1),
                                 padding=((1, 1), (1, 1)),
                                 dimension_numbers=('NCHW', 'OIHW', 'NCHW'))
    h = h + conv_bias.reshape(1, C, 1, 1)
    h = h * jnp.exp(logs_param.reshape(1, C, 1, 1) * logscale_factor)
    mean, logs = h[:, 0::2], h[:, 1::2]
    ll = -0.5 * (2.0 * logs + (z2 - mean) ** 2 / jnp.exp(2.0 * logs) + LOG2PI)
    return z1, jnp.sum(ll, axis=(1, 2, 3)) + logdet


if __name__ == "__main__":
    key = jax.random.PRNGKey(0)
    B, C, H, W = 2, 8, 16, 16          # num_features = 8
    k1, k2, k3, k4 = jax.random.split(key, 4)
    x = jax.random.normal(k1, (B, C, H, W), jnp.float32)

    # Conv2dZeros parameter shapes from __init__ (module zero-inits; use small
    # deterministic values so the kernel math is actually exercised).
    weight = 0.05 * jax.random.normal(k2, (C, C // 2, 3, 3), jnp.float32)
    conv_bias = 0.05 * jax.random.normal(k3, (C,), jnp.float32)
    logs_param = 0.05 * jax.random.normal(k4, (C, 1, 1), jnp.float32)

    z1, logdet = split2d_forward(x, weight, conv_bias, logs_param, logdet=0.0)
    jax.block_until_ready((z1, logdet))

    z1_ref, logdet_ref = reference_forward(x, weight, conv_bias, logs_param, logdet=0.0)
    assert np.allclose(np.asarray(z1), np.asarray(z1_ref)), "z1 mismatch"
    assert np.allclose(np.asarray(logdet), np.asarray(logdet_ref),
                       rtol=2e-3, atol=0.3), (logdet, logdet_ref)
    print("KERNEL_OK")
</pallas_src>

<mosaic_0001>
module attributes {stable_mosaic.version = 11 : i64} {
  func.func @_split2d_logp_kernel(%arg0: i32, %arg1: memref<1x4x512xbf16, #tpu.memory_space<vmem>>, %arg2: memref<1x4x384xf32, #tpu.memory_space<vmem>>, %arg3: memref<8x36xf32, #tpu.memory_space<vmem>>, %arg4: memref<8x1xf32, #tpu.memory_space<vmem>>, %arg5: memref<8x1xf32, #tpu.memory_space<vmem>>, %arg6: memref<1x384xf32, #tpu.memory_space<vmem>>, %arg7: memref<1x8x128xf32, #tpu.memory_space<vmem>>, %arg8: memref<36x384xf32, #tpu.memory_space<vmem>>) attributes {dimension_semantics = [#tpu.dimension_semantics<parallel>], iteration_bounds = array<i64: 2>, scalar_prefetch = 0 : i64, scratch_operands = 1 : i64, tpu.core_type = #tpu.core_type<tc>, window_params = [{transform_indices = @transform_0, window_bounds = array<i64: 1, 4, 512>}, {transform_indices = @transform_1, window_bounds = array<i64: 1, 4, 384>}, {pipeline_mode = #tpu.pipeline_mode<synchronous>, transform_indices = @transform_2, window_bounds = array<i64: 8, 36>}, {pipeline_mode = #tpu.pipeline_mode<synchronous>, transform_indices = @transform_3, window_bounds = array<i64: 8, 1>}, {pipeline_mode = #tpu.pipeline_mode<synchronous>, transform_indices = @transform_4, window_bounds = array<i64: 8, 1>}, {pipeline_mode = #tpu.pipeline_mode<synchronous>, transform_indices = @transform_5, window_bounds = array<i64: 1, 384>}, {transform_indices = @transform_6, window_bounds = array<i64: 1, 8, 128>}]} {
    %c0 = arith.constant 0 : index
    %c0_0 = arith.constant 0 : index
    %0 = vector.load %arg3[%c0, %c0_0] : memref<8x36xf32, #tpu.memory_space<vmem>>, vector<8x36xf32>
    %c0_1 = arith.constant 0 : index
    %c0_2 = arith.constant 0 : index
    %1 = vector.load %arg4[%c0_1, %c0_2] : memref<8x1xf32, #tpu.memory_space<vmem>>, vector<8x1xf32>
    %c0_3 = arith.constant 0 : index
    %c0_4 = arith.constant 0 : index
    %2 = vector.load %arg5[%c0_3, %c0_4] : memref<8x1xf32, #tpu.memory_space<vmem>>, vector<8x1xf32>
    %cst = arith.constant 0.000000e+00 : f32
    %3 = vector.broadcast %cst : f32 to vector<4x128xf32>
    %c0_5 = arith.constant 0 : index
    %c0_6 = arith.constant 0 : index
    %c0_7 = arith.constant 0 : index
    %4 = vector.load %arg1[%c0_5, %c0_6, %c0_7] : memref<1x4x512xbf16, #tpu.memory_space<vmem>>, vector<1x4x512xbf16>
    %5 = vector.shape_cast %4 : vector<1x4x512xbf16> to vector<4x512xbf16>
    %6 = arith.extf %5 : vector<4x512xbf16> to vector<4x512xf32>
    %7 = vector.extract_strided_slice %6 {offsets = [0, 0], sizes = [4, 384], strides = [1, 1]} : vector<4x512xf32> to vector<4x384xf32>
    %c0_8 = arith.constant 0 : index
    %c0_9 = arith.constant 0 : index
    %8 = vector.load %arg8[%c0_8, %c0_9] : memref<36x384xf32, #tpu.memory_space<vmem>>, vector<4x384xf32>
    tpu.vector_store %arg8[%c0_8, %c0_9], %7 {strides = array<i32>} : memref<36x384xf32, #tpu.memory_space<vmem>>, vector<4x384xf32>,
    %9 = vector.extract_strided_slice %6 {offsets = [0, 1], sizes = [4, 384], strides = [1, 1]} : vector<4x512xf32> to vector<4x384xf32>
    %c4 = arith.constant 4 : index
    %c0_10 = arith.constant 0 : index
    %10 = vector.load %arg8[%c4, %c0_10] : memref<36x384xf32, #tpu.memory_space<vmem>>, vector<4x384xf32>
    tpu.vector_store %arg8[%c4, %c0_10], %9 {strides = array<i32>} : memref<36x384xf32, #tpu.memory_space<vmem>>, vector<4x384xf32>,
    %11 = vector.extract_strided_slice %6 {offsets = [0, 2], sizes = [4, 384], strides = [1, 1]} : vector<4x512xf32> to vector<4x384xf32>
    %c8 = arith.constant 8 : index
    %c0_11 = arith.constant 0 : index
    %12 = vector.load %arg8[%c8, %c0_11] : memref<36x384xf32, #tpu.memory_space<vmem>>, vector<4x384xf32>
    tpu.vector_store %arg8[%c8, %c0_11], %11 {strides = array<i32>} : memref<36x384xf32, #tpu.memory_space<vmem>>, vector<4x384xf32>,
    %13 = vector.extract_strided_slice %6 {offsets = [0, 18], sizes = [4, 384], strides = [1, 1]} : vector<4x512xf32> to vector<4x384xf32>
    %c12 = arith.constant 12 : index
    %c0_12 = arith.constant 0 : index
    %14 = vector.load %arg8[%c12, %c0_12] : memref<36x384xf32, #tpu.memory_space<vmem>>, vector<4x384xf32>
    tpu.vector_store %arg8[%c12, %c0_12], %13 {strides = array<i32>} : memref<36x384xf32, #tpu.memory_space<vmem>>, vector<4x384xf32>,
    %15 = vector.extract_strided_slice %6 {offsets = [0, 19], sizes = [4, 384], strides = [1, 1]} : vector<4x512xf32> to vector<4x384xf32>
    %c16 = arith.constant 16 : index
    %c0_13 = arith.constant 0 : index
    %16 = vector.load %arg8[%c16, %c0_13] : memref<36x384xf32, #tpu.memory_space<vmem>>, vector<4x384xf32>
    tpu.vector_store %arg8[%c16, %c0_13], %15 {strides = array<i32>} : memref<36x384xf32, #tpu.memory_space<vmem>>, vector<4x384xf32>,
    %17 = vector.extract_strided_slice %6 {offsets = [0, 20], sizes = [4, 384], strides = [1, 1]} : vector<4x512xf32> to vector<4x384xf32>
    %c20 = arith.constant 20 : index
    %c0_14 = arith.constant 0 : index
    %18 = vector.load %arg8[%c20, %c0_14] : memref<36x384xf32, #tpu.memory_space<vmem>>, vector<4x384xf32>
    tpu.vector_store %arg8[%c20, %c0_14], %17 {strides = array<i32>} : memref<36x384xf32, #tpu.memory_space<vmem>>, vector<4x384xf32>,
    %19 = vector.extract_strided_slice %6 {offsets = [0, 36], sizes = [4, 384], strides = [1, 1]} : vector<4x512xf32> to vector<4x384xf32>
    %c24 = arith.constant 24 : index
    %c0_15 = arith.constant 0 : index
    %20 = vector.load %arg8[%c24, %c0_15] : memref<36x384xf32, #tpu.memory_space<vmem>>, vector<4x384xf32>
    tpu.vector_store %arg8[%c24, %c0_15], %19 {strides = array<i32>} : memref<36x384xf32, #tpu.memory_space<vmem>>, vector<4x384xf32>,
    %21 = vector.extract_strided_slice %6 {offsets = [0, 37], sizes = [4, 384], strides = [1, 1]} : vector<4x512xf32> to vector<4x384xf32>
    %c28 = arith.constant 28 : index
    %c0_16 = arith.constant 0 : index
    %22 = vector.load %arg8[%c28, %c0_16] : memref<36x384xf32, #tpu.memory_space<vmem>>, vector<4x384xf32>
    tpu.vector_store %arg8[%c28, %c0_16], %21 {strides = array<i32>} : memref<36x384xf32, #tpu.memory_space<vmem>>, vector<4x384xf32>,
    %23 = vector.extract_strided_slice %6 {offsets = [0, 38], sizes = [4, 384], strides = [1, 1]} : vector<4x512xf32> to vector<4x384xf32>
    %c32 = arith.constant 32 : index
    %c0_17 = arith.constant 0 : index
    %24 = vector.load %arg8[%c32, %c0_17] : memref<36x384xf32, #tpu.memory_space<vmem>>, vector<4x384xf32>
    tpu.vector_store %arg8[%c32, %c0_17], %23 {strides = array<i32>} : memref<36x384xf32, #tpu.memory_space<vmem>>, vector<4x384xf32>,
    %c0_18 = arith.constant 0 : index
    %c0_19 = arith.constant 0 : index
    %25 = vector.load %arg8[%c0_18, %c0_19] : memref<36x384xf32, #tpu.memory_space<vmem>>, vector<36x384xf32>
    %cst_20 = arith.constant dense<0.000000e+00> : vector<8x384xf32>
    %26 = tpu.matmul %0, %25, %cst_20 {dimension_numbers = #tpu.dot_dimension_numbers<[1], [0], [0], [1], [0, 0, 1, 1], [], []>} : vector<8x36xf32>, vector<36x384xf32>, vector<8x384xf32> -> vector<8x384xf32>
    %27 = vector.broadcast %1 : vector<8x1xf32> to vector<8x384xf32>
    %28 = arith.addf %26, %27 : vector<8x384xf32>
    %29 = vector.broadcast %2 : vector<8x1xf32> to vector<8x384xf32>
    %30 = arith.mulf %28, %29 : vector<8x384xf32>
    %31 = vector.extract_strided_slice %30 {offsets = [0, 0], sizes = [4, 384], strides = [1, 1]} : vector<8x384xf32> to vector<4x384xf32>
    %32 = vector.extract_strided_slice %30 {offsets = [4, 0], sizes = [4, 384], strides = [1, 1]} : vector<8x384xf32> to vector<4x384xf32>
    %c0_21 = arith.constant 0 : index
    %c0_22 = arith.constant 0 : index
    %c0_23 = arith.constant 0 : index
    %33 = vector.load %arg2[%c0_21, %c0_22, %c0_23] : memref<1x4x384xf32, #tpu.memory_space<vmem>>, vector<1x4x384xf32>
    %34 = vector.shape_cast %33 : vector<1x4x384xf32> to vector<4x384xf32>
    %c0_24 = arith.constant 0 : index
    %c0_25 = arith.constant 0 : index
    %35 = vector.load %arg6[%c0_24, %c0_25] : memref<1x384xf32, #tpu.memory_space<vmem>>, vector<1x384xf32>
    %36 = vector.broadcast %35 : vector<1x384xf32> to vector<4x384xf32>
    %37 = arith.mulf %32, %36 : vector<4x384xf32>
    %38 = arith.subf %34, %31 : vector<4x384xf32>
    %39 = vector.broadcast %35 : vector<1x384xf32> to vector<4x384xf32>
    %40 = arith.mulf %38, %39 : vector<4x384xf32>
    %cst_26 = arith.constant 0.000000e+00 : f32
    %41 = vector.broadcast %cst_26 : f32 to vector<4x384xf32>
    %42 = arith.subf %41, %37 : vector<4x384xf32>
    %43 = math.exp %42 : vector<4x384xf32>
    %44 = arith.mulf %40, %43 : vector<4x384xf32>
    %cst_27 = arith.constant 5.000000e-01 : f32
    %45 = vector.broadcast %cst_27 : f32 to vector<4x384xf32>
    %46 = arith.mulf %45, %44 : vector<4x384xf32>
    %47 = arith.mulf %46, %44 : vector<4x384xf32>
    %48 = arith.addf %37, %47 : vector<4x384xf32>
    %49 = vector.extract_strided_slice %48 {offsets = [0, 0], sizes = [4, 128], strides = [1, 1]} : vector<4x384xf32> to vector<4x128xf32>
    %50 = arith.addf %3, %49 : vector<4x128xf32>
    %51 = vector.extract_strided_slice %48 {offsets = [0, 128], sizes = [4, 128], strides = [1, 1]} : vector<4x384xf32> to vector<4x128xf32>
    %52 = arith.addf %50, %51 : vector<4x128xf32>
    %53 = vector.extract_strided_slice %48 {offsets = [0, 256], sizes = [4, 128], strides = [1, 1]} : vector<4x384xf32> to vector<4x128xf32>
    %54 = arith.addf %52, %53 : vector<4x128xf32>
    %cst_28 = arith.constant 0.000000e+00 : f32
    %55 = vector.broadcast %cst_28 : f32 to vector<8x128xf32>
    %c0_29 = arith.constant 0 : index
    %c0_30 = arith.constant 0 : index
    %c0_31 = arith.constant 0 : index
    %56 = vector.load %arg7[%c0_29, %c0_30, %c0_31] : memref<1x8x128xf32, #tpu.memory_space<vmem>>, vector<1x8x128xf32>
    %57 = vector.shape_cast %56 : vector<1x8x128xf32> to vector<8x128xf32>
    %58 = vector.shape_cast %55 : vector<8x128xf32> to vector<1x8x128xf32>
    tpu.vector_store %arg7[%c0_29, %c0_30, %c0_31], %58 {strides = array<i32>} : memref<1x8x128xf32, #tpu.memory_space<vmem>>, vector<1x8x128xf32>,
    %c0_32 = arith.constant 0 : index
    %c0_33 = arith.constant 0 : index
    %c0_34 = arith.constant 0 : index
    %59 = vector.load %arg7[%c0_32, %c0_33, %c0_34] : memref<1x8x128xf32, #tpu.memory_space<vmem>>, vector<1x4x128xf32>
    %60 = vector.shape_cast %59 : vector<1x4x128xf32> to vector<4x128xf32>
    %61 = vector.shape_cast %54 : vector<4x128xf32> to vector<1x4x128xf32>
    tpu.vector_store %arg7[%c0_32, %c0_33, %c0_34], %61 {strides = array<i32>} : memref<1x8x128xf32, #tpu.memory_space<vmem>>, vector<1x4x128xf32>,
    return
  }
  func.func @transform_0(%arg0: i32) -> (i32, i32, i32) {
    %c0_i32 = arith.constant 0 : i32
    %c0_i32_0 = arith.constant 0 : i32
    %c0_i32_1 = arith.constant 0 : i32
    return %arg0, %c0_i32, %c0_i32_0 : i32, i32, i32
  }
  func.func @transform_1(%arg0: i32) -> (i32, i32, i32) {
    %c0_i32 = arith.constant 0 : i32
    %c0_i32_0 = arith.constant 0 : i32
    %c0_i32_1 = arith.constant 0 : i32
    return %arg0, %c0_i32, %c0_i32_0 : i32, i32, i32
  }
  func.func @transform_2(%arg0: i32) -> (i32, i32) {
    %c0_i32 = arith.constant 0 : i32
    %c0_i32_0 = arith.constant 0 : i32
    %c0_i32_1 = arith.constant 0 : i32
    return %c0_i32, %c0_i32_0 : i32, i32
  }
  func.func @transform_3(%arg0: i32) -> (i32, i32) {
    %c0_i32 = arith.constant 0 : i32
    %c0_i32_0 = arith.constant 0 : i32
    %c0_i32_1 = arith.constant 0 : i32
    return %c0_i32, %c0_i32_0 : i32, i32
  }
  func.func @transform_4(%arg0: i32) -> (i32, i32) {
    %c0_i32 = arith.constant 0 : i32
    %c0_i32_0 = arith.constant 0 : i32
    %c0_i32_1 = arith.constant 0 : i32
    return %c0_i32, %c0_i32_0 : i32, i32
  }
  func.func @transform_5(%arg0: i32) -> (i32, i32) {
    %c0_i32 = arith.constant 0 : i32
    %c0_i32_0 = arith.constant 0 : i32
    %c0_i32_1 = arith.constant 0 : i32
    return %c0_i32, %c0_i32_0 : i32, i32
  }
  func.func @transform_6(%arg0: i32) -> (i32, i32, i32) {
    %c0_i32 = arith.constant 0 : i32
    %c0_i32_0 = arith.constant 0 : i32
    %c0_i32_1 = arith.constant 0 : i32
    return %arg0, %c0_i32, %c0_i32_0 : i32, i32, i32
  }
}

</mosaic_0001>

<bundles_post_ra>
// kernel: tpu_custom_call.1
= control target key start
LH: loop header
LB: loop body
LE: loop exit
PB: predicated region body
PF: predicated region fallthrough
CT: control target
= control target key end

     0   :  { %s1331_s0 = inlined_call_operand.vmem [shape: bf16[2,4,512], index: 0, kind: input, shape index: {}]   ;;  %s1332_s1 = inlined_call_operand.hbm [shape: f32[2,4,384], index: 1, kind: input, shape index: {}]   ;;  %s1333_s2 = inlined_call_operand.hbm [shape: f32[8,36], index: 2, kind: input, shape index: {}]   ;;  %s1334_s3 = inlined_call_operand.vmem [shape: f32[8,1], index: 3, kind: input, shape index: {}]   ;;  %s1335_s4 = inlined_call_operand.vmem [shape: f32[8,1], index: 4, kind: input, shape index: {}]   ;;  %s1336_s5 = inlined_call_operand.vmem [shape: f32[1,384], index: 5, kind: input, shape index: {}]   ;;  %s1337_s6 = inlined_call_operand.hbm [shape: f32[2,8,128], index: 6, kind: output, shape index: {}]  }
   0x1   :  { %1338 = sst [smem:[#allocation13_spill]] %s1333_s2 }
   0x2   :  { %11 = vsyncpa [#allocation4], 0 }
   0x3   :  { %13 = vsyncpa [#allocation4 + $0x1], 0 }
   0x4   :  { %14 = vsyncpa [#allocation7], 0 }
   0x5   :  { %15 = vsyncpa [#allocation5], 0 }
   0x6   :  { %17 = vsyncpa [#allocation5 + $0x1], 0  ;;  %s1088_s21 = smov 0   ;;  %s1090_s22 = smov 0  }
   0x7   :  { %s1092_s23 = smov 0   ;;  %s1094_s24 = smov 0  }
   0x8 LB: > { %s1109_s25 = sadd.s32 4294967295, %s1040_s24   ;;  %s811_s26 = sadd.s32 4294967294, %s1040_s24   ;;  %s1040_s24 = sphi %s1094_s24, %s1351_s24   ;;  %s1036_s23 = sphi %s1092_s23, %s1350_s23   ;;  %s1032_s22 = sphi %s1090_s22, %s1349_s22   ;;  %s1028_s21 = sphi %s1088_s21, %s1348_s21  }
   0x9   : > { %p69_p0 = scmp.ne.s32.totalorder %s1032_s22, %s1028_s21  ;;  %p70_p1 = scmp.eq.s32.totalorder %s1109_s25, 0 }
   0xa   : > { %p177_p2 = scmp.eq.s32.totalorder %s1109_s25, 1  ;;  %p183_p3 = scmp.eq.s32.totalorder %s811_s26, 1 }
   0xb   : > { %p1118_p4 = por %p70_p1, %p69_p0  ;;  %p812_p5 = scmp.ge.s32.totalorder %s1040_s24, 1 }
   0xc   : > { %p1123_p6 = por %p183_p3, %p69_p0  ;;  %p190_p7 = scmp.lt.s32.totalorder %s1040_s24, 3 }
   0xd   : > { %s1341_s2 = sld [smem:[#allocation13_spill]]  ;;  %s1042_s9 = smov [#allocation6]  }
   0xe   : > { %p1131_p8 = pnand %p812_p5, %p190_p7  ;;  %s204_s10 = sshll.u32 %s1042_s9, 4  ;;  %s205_s10 = int_to_ptr.vmem [resolvable:$true] %s204_s10 }
   0xf   : > { %s1141_s11 = sadd.s32 1, %s1040_s24   ;;  %s56_s12 = sadd.s32 1, %s1036_s23 }
  0x10   : > { %p843_p10 = pneg %p1131_p8  ;;  %s53_s13 = ssub.s32 %s1040_s24, %s1141_s11 }
  0x11   : > { %p54_p12 = scmp.eq.s32.totalorder %s53_s13, 0  ;;  %p63_p13 = scmp.ne.s32.totalorder %s1036_s23, %s1032_s22 }
  0x12   : > { %p844_p11 = pnand %p843_p10, %p70_p1  ;;  %p64_p0 = scmp.eq.s32.totalorder %s1040_s24, 0 }
  0x13   : > { %s202_s7 = sshll.u32 %s1341_s2, 4  ;;  %p856_p3 = scmp.lt.s32.totalorder %s1040_s24, 2  ;;  %s203_s7 = int_to_ptr.hbm [resolvable:$true] %s202_s7 }
  0x14   : > { %846 = dma.hbm_to_vmem [thread:$0]  (!%p844_p11), %s203_s7, 128, %s205_s10, [#allocation7]  }
  0x15   : > { %s1151_s14 = scalar_select %p54_p12, %s1036_s23, %s56_s12  }
  0x16   : > { %p65_p5 = por %p64_p0, %p63_p13  ;;  %p1155_p7 = por %p177_p2, %p63_p13 }
  0x17   : > { %1343 = sst [smem:[#allocation12_spill]] %s1151_s14  ;;  %s232_s16 = sand.u32 1, %s1036_s23  }
  0x18   : > { %s833_s17 = smul.u32 12, %s1040_s24  ;;  %p1164_p10 = pnand %p856_p3, %p65_p5 }
  0x19   : > { %s832_s18 = smul.u32 12, %s232_s16  ;;  %s233_s10 = scalar_lea.sflag [#allocation4], %s232_s16 }
  0x1a   : > { %s241_s26 = scalar_lea.hbm %s1332_s1, %s833_s17  ;;  %p944_p11 = pneg %p1164_p10 }
  0x1b   : > { %s243_s30 = sshll.u32 %s241_s26, 4  ;;  %s236_s7 = scalar_lea.vmem [#allocation3], %s832_s18  ;;  %s244_s30 = int_to_ptr.hbm [resolvable:$true] %s243_s30 }
  0x1c   : > { %s245_s9 = sshll.u32 %s236_s7, 4  ;;  %s940_s12 = sshra.s32 %s244_s30, 4  ;;  %s246_s9 = int_to_ptr.vmem [resolvable:$true] %s245_s9  ;;  %s941_s12 = int_to_ptr.hbm [resolvable:$true] %s940_s12 }
  0x1d   : > { %s942_s13 = scalar_lea.hbm %s941_s12, 12  ;;  %s947_s20 = scalar_lea.hbm %s1332_s1, 24 }
  0x1e   : > { %p943_p2 = scmp.ne.s32.totalorder %s941_s12, %s942_s13  ;;  %p948_p0 = scmp.lt.s32.totalorder %s941_s12, %s1332_s1 }
  0x1f   : > { %p949_p3 = scmp.lt.s32.totalorder %s947_s20, %s942_s13 }
  0x20   : > { %p945_p12 = pnand %p944_p11, %p943_p2 }
  0x21   : > { %p950_p5 = por %p949_p3, %p948_p0 }
  0x22   : > { %p946_p13 = pneg %p945_p12 }
  0x24   : > { %p951_p9 = pnand %p950_p5, %p946_p13 }
  0x26   : > { %954 = shalt.err (!%p951_p9)
}
  0x27   : > { %850 = dma.hbm_to_vmem [thread:$0]  (!%p1164_p10), %s244_s30, 192, %s246_s9, %s233_s10  }
  0x28   : > { %254 = sbr.rel (%p1131_p8) target bundleno = 469 (0x1d5), region = 44  ;;  %s1181_s16 = sand.u32 (!%p1131_p8), 1, %s1032_s22  }
  0x29   : > { %s834_s18 = smul.u32 (!%p1131_p8), 12, %s1181_s16  ;;  %s257_s26 = scalar_lea.sflag (!%p1131_p8), [#allocation4], %s1181_s16 }
  0x2b   : > { %s1185_s2 = scalar_lea.vmem (!%p1131_p8), [#allocation3], %s834_s18 }
  0x2d   : > { %1015 = dma.done.wait (%p1118_p4), %s257_s26, 192  }
  0x2e   : > { %1017 = vsyncadd (%p1118_p4), %s257_s26, 4294967104 }
  0x2f   : > { %1019 = dma.done.wait (%p70_p1), [#allocation7], 128  }
  0x30   : > { %1021 = vsyncadd (%p70_p1), [#allocation7], 4294967168  ;;  %p300_p8 = scmp.lt.s32.totalorder %s1109_s25, 1  ;;  %s1043_s27 = smov 127   ;;  %vm341_vm0 = vcmask 1039360   ;;  %vm366_vm1 = vcmask 1031168  }
  0x31   : > { %s1044_s9 = smov 126   ;;  %s1045_s10 = smov 110   ;;  %vm392_vm2 = vcmask 900096   ;;  %vm417_vm3 = vcmask 891904   ;;  %vm443_vm4 = vcmask 883712   ;;  %vm494_vm5 = vcmask 744448  }
  0x32   : > { %s301_s8 = scalar_select %p300_p8, %s1109_s25, 1  ;;  %vm468_vm6 = vcmask 752640   ;;  %vm519_vm7 = vcmask 736256   ;;  %vm553_vm8 = vcmask 1043456   ;;  %vm549_vm9 = vcmask 293888  }
  0x33   : > { %s1046_s12 = smov 109   ;;  %s1047_s13 = smov 108  }
  0x34   : > { %s831_s14 = sshll.u32 %s301_s8, 3  ;;  %s1048_s17 = smov 92  }
  0x35   : > { %s304_s7 = scalar_lea.vmem %s1331_s0, %s831_s14  ;;  %s1049_s19 = smov 91  }
  0x36   : > { %v308_v0 = vld [vmem:[%s304_s7] sm:$0xff]  ;;  %s1050_s20 = smov 90   ;;  %s818_s7 = sshll.u32 %s1181_s16, 3 }
  0x37   : > { %v1200_v1 = vunpack.c.h.bf16 %v308_v0  ;;  %v1202_v2 = vunpack.c.l.bf16 %v308_v0  ;;  %s990_s8 = scalar_lea.hbm %s1337_s6, 16 }
  0x39   : > { %315 = vst [vmem:[#allocation1 + $0x10] ss:$2 sm:$0xff] %v1200_v1 }
  0x3a   : > { %313 = vst [vmem:[#allocation1] ss:$2 sm:$0xff] %v1202_v2 }
  0x40   : > { %v318_v3 = vld.sshfl [vmem:[#allocation1 + $0x10] sm:$0xff pattern:$0x75316420] }
  0x41   : > { %328 = vst [vmem:[#allocation1 + $0x11] ss:$2 sm:$0xff] %v1200_v1  ;;  %v316_v4 = vld.sshfl [vmem:[#allocation1] sm:$0xff pattern:$0x75316420] }
  0x42   : > { %324 = vst [vmem:[#allocation2 + $0x58] sm:$0xf] %v318_v3  ;;  %v317_v5 = vld.sshfl [vmem:[#allocation1 + $0x8] sm:$0xff pattern:$0x75316420] }
  0x43   : > { %326 = vst [vmem:[#allocation1 + $0x1] ss:$2 sm:$0xff] %v1202_v2 }
  0x44   : > { %322 = vst [vmem:[#allocation2 + $0x30] sm:$0xf] %v316_v4 }
  0x45   : > { %323 = vst [vmem:[#allocation2] sm:$0xf] %v317_v5 }
  0x48   : > { %v332_v6 = vld.sshfl [vmem:[#allocation1 + $0x18] sm:$0xff pattern:$0x75316420]  ;;  %v331_v7 = vld.sshfl [vmem:[#allocation1 + $0x10] sm:$0xff pattern:$0x75316420] }
  0x49   : > { %339 = vrot.lane.b32.xlu0 %v332_v6, %s1043_s27  ;;  %337 = vrot.lane.b32.xlu2 %v331_v7, %s1043_s27  ;;  %353 = vst [vmem:[#allocation1 + $0x10] ss:$2 sm:$0xff] %v1200_v1 }
  0x4a   : > { %v1211_v8 = vld.sshfl [vmem:[#allocation1] sm:$0xff pattern:$0x75316420]  ;;  %v1213_v9 = vld.sshfl [vmem:[#allocation1 + $0x8] sm:$0xff pattern:$0x75316420] }
  0x4b   : > { %351 = vst [vmem:[#allocation1] ss:$2 sm:$0xff] %v1202_v2 }
  0x50   : > { %v356_v10 = vld.sshfl [vmem:[#allocation1 + $0x10] sm:$0xff pattern:$0x75316420]  ;;  %v357_v11 = vld.sshfl [vmem:[#allocation1 + $0x18] sm:$0xff pattern:$0x75316420] }
  0x51   : > { %362 = vrot.lane.b32.xlu0 %v356_v10, %s1044_s9  ;;  %364 = vrot.lane.b32.xlu1 %v357_v11, %s1044_s9  ;;  %379 = vst [vmem:[#allocation1 + $0x11] ss:$2 sm:$0xff] %v1200_v1 }
  0x52   : > { %v354_v12 = vld.sshfl [vmem:[#allocation1] sm:$0xff pattern:$0x75316420]  ;;  %v355_v13 = vld.sshfl [vmem:[#allocation1 + $0x8] sm:$0xff pattern:$0x75316420] }
  0x53   : > { %358 = vrot.lane.b32.xlu2 %v354_v12, %s1044_s9  ;;  %377 = vst [vmem:[#allocation1 + $0x1] ss:$2 sm:$0xff] %v1202_v2 }
  0x58   : > { %v383_v14 = vld.sshfl [vmem:[#allocation1 + $0x18] sm:$0xff pattern:$0x75316420]  ;;  %v382_v15 = vld.sshfl [vmem:[#allocation1 + $0x10] sm:$0xff pattern:$0x75316420] }
  0x59   : > { %390 = vrot.lane.b32.xlu0 %v383_v14, %s1045_s10  ;;  %404 = vst [vmem:[#allocation1 + $0x10] ss:$2 sm:$0xff] %v1200_v1 }
  0x5a   : > { %v380_v16 = vld.sshfl [vmem:[#allocation1] sm:$0xff pattern:$0x75316420]  ;;  %v381_v17 = vld.sshfl [vmem:[#allocation1 + $0x8] sm:$0xff pattern:$0x75316420] }
  0x5b   : > { %402 = vst [vmem:[#allocation1] ss:$2 sm:$0xff] %v1202_v2  ;;  %388 = vrot.lane.b32.xlu2 %v382_v15, %s1045_s10 }
  0x60   : > { %v408_v18 = vld.sshfl [vmem:[#allocation1 + $0x18] sm:$0xff pattern:$0x75316420]  ;;  %v407_v19 = vld.sshfl [vmem:[#allocation1 + $0x10] sm:$0xff pattern:$0x75316420] }
  0x61   : > { %415 = vrot.lane.b32.xlu1 %v408_v18, %s1046_s12  ;;  %413 = vrot.lane.b32.xlu0 %v407_v19, %s1046_s12  ;;  %430 = vst [vmem:[#allocation1 + $0x11] ss:$2 sm:$0xff] %v1200_v1  ;;  %v307_v18 = vld [vmem:[%s1335_s4] sm:$0xff] }
  0x62   : > { %v406_v20 = vld.sshfl [vmem:[#allocation1 + $0x8] sm:$0xff pattern:$0x75316420]  ;;  %v405_v21 = vld.sshfl [vmem:[#allocation1] sm:$0xff pattern:$0x75316420] }
  0x63   : > { %411 = vrot.lane.b32.xlu2 %v406_v20, %s1046_s12  ;;  %428 = vst [vmem:[#allocation1 + $0x1] ss:$2 sm:$0xff] %v1202_v2 }
  0x68   : > { %v434_v22 = vld.sshfl [vmem:[#allocation1 + $0x18] sm:$0xff pattern:$0x75316420]  ;;  %v433_v23 = vld.sshfl [vmem:[#allocation1 + $0x10] sm:$0xff pattern:$0x75316420] }
  0x69   : > { %441 = vrot.lane.b32.xlu0 %v434_v22, %s1047_s13  ;;  %455 = vst [vmem:[#allocation1 + $0x10] ss:$2 sm:$0xff] %v1200_v1  ;;  %409 = vrot.lane.b32.xlu1 %v405_v21, %s1046_s12 }
  0x6a   : > { %v432_v24 = vld.sshfl [vmem:[#allocation1 + $0x8] sm:$0xff pattern:$0x75316420]  ;;  %v431_v25 = vld.sshfl [vmem:[#allocation1] sm:$0xff pattern:$0x75316420] }
  0x6b   : > { %439 = vrot.lane.b32.xlu2 %v433_v23, %s1047_s13  ;;  %453 = vst [vmem:[#allocation1] ss:$2 sm:$0xff] %v1202_v2 }
  0x70   : > { %v459_v26 = vld.sshfl [vmem:[#allocation1 + $0x18] sm:$0xff pattern:$0x75316420]  ;;  %v458_v27 = vld.sshfl [vmem:[#allocation1 + $0x10] sm:$0xff pattern:$0x75316420] }
  0x71   : > { %437 = vrot.lane.b32.xlu1 %v432_v24, %s1047_s13  ;;  %435 = vrot.lane.b32.xlu0 %v431_v25, %s1047_s13  ;;  %481 = vst [vmem:[#allocation1 + $0x11] ss:$2 sm:$0xff] %v1200_v1 }
  0x72   : > { %v457_v28 = vld.sshfl [vmem:[#allocation1 + $0x8] sm:$0xff pattern:$0x75316420]  ;;  %v456_v29 = vld.sshfl [vmem:[#allocation1] sm:$0xff pattern:$0x75316420] }
  0x73   : > { %462 = vrot.lane.b32.xlu2 %v457_v28, %s1048_s17  ;;  %479 = vst [vmem:[#allocation1 + $0x1] ss:$2 sm:$0xff] %v1202_v2 }
  0x78   : > { %v484_v30 = vld.sshfl [vmem:[#allocation1 + $0x10] sm:$0xff pattern:$0x75316420]  ;;  %v485_v31 = vld.sshfl [vmem:[#allocation1 + $0x18] sm:$0xff pattern:$0x75316420] }
  0x79   : > { %464 = vrot.lane.b32.xlu1 %v458_v27, %s1048_s17  ;;  %506 = vst [vmem:[#allocation1 + $0x10] ss:$2 sm:$0xff] %v1200_v1 }
  0x7a   : > { %v483_v32 = vld.sshfl [vmem:[#allocation1 + $0x8] sm:$0xff pattern:$0x75316420]  ;;  %v482_v33 = vld.sshfl [vmem:[#allocation1] sm:$0xff pattern:$0x75316420] }
  0x7b   : > { %490 = vrot.lane.b32.xlu2 %v484_v30, %s1049_s19  ;;  %486 = vrot.lane.b32.xlu0 %v482_v33, %s1049_s19  ;;  %504 = vst [vmem:[#allocation1] ss:$2 sm:$0xff] %v1202_v2  ;;  %v305_v33 = vld [vmem:[#allocation6] sm:$0xff] }
  0x80   : > { %v509_v34 = vld.sshfl [vmem:[#allocation1 + $0x10] sm:$0xff pattern:$0x75316420]  ;;  %v510_v35 = vld.sshfl [vmem:[#allocation1 + $0x18] sm:$0xff pattern:$0x75316420] }
  0x81   : > { %466 = vrot.lane.b32.xlu1 %v459_v26, %s1048_s17  ;;  %v306_v26 = vld [vmem:[%s1334_s3] sm:$0xff] }
  0x82   : > { %v508_v36 = vld.sshfl [vmem:[#allocation1 + $0x8] sm:$0xff pattern:$0x75316420]  ;;  %v507_v37 = vld.sshfl [vmem:[#allocation1] sm:$0xff pattern:$0x75316420] }
  0x83   : > { %492 = vrot.lane.b32.xlu2 %v485_v31, %s1049_s19  ;;  %515 = vrot.lane.b32.xlu0 %v509_v34, %s1050_s20 }
  0x89   : > { %460 = vrot.lane.b32.xlu1 %v456_v29, %s1048_s17 }
  0x8b   : > { %517 = vrot.lane.b32.xlu0 %v510_v35, %s1050_s20  ;;  %513 = vrot.lane.b32.xlu2 %v508_v36, %s1050_s20 }
  0x91   : > { %488 = vrot.lane.b32.xlu1 %v483_v32, %s1049_s19  ;;  %s704_s19 = scalar_lea.sflag [#allocation5], %s1181_s16 }
  0x93   : > { %360 = vrot.lane.b32.xlu0 %v355_v13, %s1044_s9  ;;  %386 = vrot.lane.b32.xlu2 %v381_v17, %s1045_s10  ;;  %v1051_v17 = vmov 0   ;;  %s828_s9 = sshll.u32 %s1109_s25, 3 }
  0x94   : > { %903 = vset.pattern.permute.xlu0 %v1051_v17  ;;  %902 = vset.pattern.permute.xlu2 %v1051_v17  ;;  %s714_s12 = scalar_lea.hbm %s1337_s6, %s828_s9 }
  0x95   : > { %s718_s17 = sshll.u32 %s714_s12, 4  ;;  %s719_s17 = int_to_ptr.hbm [resolvable:$true] %s718_s17 }
  0x96   : > { %s984_s25 = sshra.s32 %s719_s17, 4  ;;  %s985_s25 = int_to_ptr.hbm [resolvable:$true] %s984_s25 }
  0x97   : > { %p991_p10 = scmp.lt.s32.totalorder %s985_s25, %s1337_s6 }
  0x99   : > { %384 = vrot.lane.b32.xlu1 %v380_v16, %s1045_s10 }
  0x9b   : > { %333 = vrot.lane.b32.xlu0 %v1211_v8, %s1043_s27  ;;  %546 = vperm.xlu2 %902, %v306_v26  }
  0xa1   : > { %511 = vrot.lane.b32.xlu1 %v507_v37, %s1050_s20  ;;  %s986_s20 = scalar_lea.hbm %s985_s25, 8 }
  0xa2   : > { %p987_p1 = scmp.ne.s32.totalorder %s985_s25, %s986_s20  ;;  %p992_p2 = scmp.lt.s32.totalorder %s990_s8, %s986_s20 }
  0xa3   : > { %v1238_v38 = vpop.permute.xlu2 %337  ;;  %625 = vperm.xlu0 %903, %v307_v18   ;;  %v1052_v18 = vmov 0.0  }
  0xa4   : > { %p988_p4 = pnand %p987_p1, %p1155_p7  ;;  %p993_p11 = por %p992_p2, %p991_p10 }
  0xa6   : > { %p989_p9 = pneg %p988_p4 }
  0xa8   : > { %p994_p12 = pnand %p993_p11, %p989_p9 }
  0xa9   : > { %335 = vrot.lane.b32.xlu1 %v1213_v9, %s1043_s27  ;;  %s1290_s27 = scalar_lea.vmem [#allocation8], %s818_s7 }
  0xaa   : > { %701 = vst [vmem:[%s1290_s27] sm:$0xff] %v1052_v18  ;;  %s716_s13 = sshll.u32 %s1290_s27, 4  ;;  %s717_s13 = int_to_ptr.vmem [resolvable:$true] %s716_s13 }
  0xad   : > { %v1242_v39 = vpop.permute.xlu2 %358 }
  0xb5   : > { %v389_v40 = vpop.permute.xlu2 %388 }
  0xbb   : > { %v340_v41 = vpop.permute.xlu0 %339 }
  0xbc   : > { %v344_v42 = vsel %vm341_vm0, %v1238_v38, %v340_v41 }
  0xbd   : > { %350 = vst [vmem:[#allocation2 + $0x58] sm:$0xf0] %v344_v42  ;;  %v412_v43 = vpop.permute.xlu2 %411 }
  0xc3   : > { %v1246_v44 = vpop.permute.xlu0 %362  ;;  %v365_v45 = vpop.permute.xlu1 %364 }
  0xc4   : > { %v369_v46 = vsel %vm366_vm1, %v1246_v44, %v365_v45  ;;  %v531_v34 = vld [vmem:[#allocation2 + $0x58] sm:$0xff] }
  0xc5   : > { %v440_v47 = vpop.permute.xlu2 %439  ;;  %375 = vst [vmem:[#allocation2 + $0x68] sm:$0xf] %v369_v46 }
  0xcb   : > { %v391_v48 = vpop.permute.xlu0 %390 }
  0xcc   : > { %v395_v49 = vsel %vm392_vm2, %v389_v40, %v391_v48 }
  0xcd   : > { %401 = vst [vmem:[#allocation2 + $0x68] sm:$0xf0] %v395_v49  ;;  %v463_v50 = vpop.permute.xlu2 %462 }
  0xd3   : > { %v416_v51 = vpop.permute.xlu1 %415  ;;  %v414_v52 = vpop.permute.xlu0 %413 }
  0xd4   : > { %v419_v53 = vsel %vm417_vm3, %v412_v43, %v414_v52  ;;  %v420_v54 = vsel %vm417_vm3, %v414_v52, %v416_v51  ;;  %v534_v31 = vld [vmem:[#allocation2 + $0x68] sm:$0xff] }
  0xd5   : > { %425 = vst [vmem:[#allocation2 + $0x48] sm:$0xf] %v419_v53  ;;  %v491_v55 = vpop.permute.xlu2 %490 }
  0xd6   : > { %426 = vst [vmem:[#allocation2 + $0x40] sm:$0xf] %v420_v54 }
  0xdb   : > { %v442_v56 = vpop.permute.xlu0 %441  ;;  %v410_v57 = vpop.permute.xlu1 %409 }
  0xdc   : > { %v446_v58 = vsel %vm443_vm4, %v440_v47, %v442_v56  ;;  %v418_v59 = vsel %vm417_vm3, %v410_v57, %v412_v43 }
  0xdd   : > { %452 = vst [vmem:[#allocation2 + $0x40] sm:$0xf0] %v446_v58  ;;  %v493_v60 = vpop.permute.xlu2 %492 }
  0xde   : > { %424 = vst [vmem:[#allocation2 + $0x8] sm:$0xf] %v418_v59  ;;  %v497_v61 = vsel %vm494_vm5, %v491_v55, %v493_v60  ;;  %v632_v59 = vld [vmem:[%s1185_s2 + $0x8] sm:$0xf] }
  0xdf   : > { %503 = vst [vmem:[#allocation2 + $0x38] sm:$0xf0] %v497_v61 }
  0xe3   : > { %v438_v62 = vpop.permute.xlu1 %437  ;;  %v436_v63 = vpop.permute.xlu0 %435 }
  0xe4   : > { %v445_v0 = vsel %vm443_vm4, %v438_v62, %v440_v47  ;;  %v444_v1 = vsel %vm443_vm4, %v436_v63, %v438_v62  ;;  %v537_v28 = vld [vmem:[#allocation2 + $0x40] sm:$0xff] }
  0xe5   : > { %451 = vst [vmem:[#allocation2 + $0x48] sm:$0xf0] %v445_v0  ;;  %v1252_v2 = vpop.permute.xlu2 %513 }
  0xe6   : > { %450 = vst [vmem:[#allocation2 + $0x8] sm:$0xf0] %v444_v1 }
  0xeb   : > { %v465_v3 = vpop.permute.xlu1 %464 }
  0xec   : > { %v470_v4 = vsel %vm468_vm6, %v463_v50, %v465_v3  ;;  %v536_v35 = vld [vmem:[#allocation2 + $0x48] sm:$0xff] }
  0xed   : > { %476 = vst [vmem:[#allocation2 + $0x10] sm:$0xf] %v470_v4  ;;  %v487_v5 = vpop.permute.xlu0 %486  ;;  %v387_v6 = vpop.permute.xlu2 %386  ;;  %v535_v46 = vld [vmem:[#allocation2 + $0x8] sm:$0xff] }
  0xee   : > { %v394_v7 = vsel %vm392_vm2, %v387_v6, %v389_v40 }
  0xef   : > { %400 = vst [vmem:[#allocation2 + $0x50] sm:$0xf0] %v394_v7 }
  0xf3   : > { %v467_v8 = vpop.permute.xlu1 %466 }
  0xf4   : > { %v471_v9 = vsel %vm468_vm6, %v465_v3, %v467_v8 }
  0xf5   : > { %477 = vst [vmem:[#allocation2 + $0x38] sm:$0xf] %v471_v9  ;;  %v516_v10 = vpop.permute.xlu0 %515 }
  0xf6   : > { %v521_v11 = vsel %vm519_vm7, %v1252_v2, %v516_v10 }
  0xf7   : > { %527 = vst [vmem:[#allocation2 + $0x70] sm:$0xf] %v521_v11 }
  0xfb   : > { %v461_v12 = vpop.permute.xlu1 %460 }
  0xfc   : > { %v469_v13 = vsel %vm468_vm6, %v461_v12, %v463_v50  ;;  %v540_v27 = vld [vmem:[#allocation2 + $0x38] sm:$0xff] }
  0xfd   : > { %475 = vst [vmem:[#allocation2 + $0x20] sm:$0xf] %v469_v13  ;;  %v518_v14 = vpop.permute.xlu0 %517  ;;  %v633_v50 = vld [vmem:[%s1336_s5] sm:$0x7] }
  0xfe   : > { %v522_v15 = vsel %vm519_vm7, %v516_v10, %v518_v14  ;;  %v542_v16 = vld [vmem:[#allocation2 + $0x70] sm:$0xf]  ;;  %v637_v54 = vperm.slane %v633_v50, 2  ;;  %v635_v63 = vperm.slane %v633_v50, 0  ;;  %v636_v3 = vperm.slane %v633_v50, 1 }
  0xff   : > { %528 = vst [vmem:[#allocation2 + $0x28] sm:$0xf] %v522_v15  ;;  %823 = vmatpush.msk.msra.mxu1 %vm553_vm8, %v542_v16 }
 0x103   : > { %v489_v19 = vpop.permute.xlu1 %488 }
 0x104   : > { %v495_v20 = vsel %vm494_vm5, %v487_v5, %v489_v19  ;;  %v496_v21 = vsel %vm494_vm5, %v489_v19, %v491_v55 }
 0x105   : > { %501 = vst [vmem:[#allocation2 + $0x20] sm:$0xf0] %v495_v20  ;;  %v361_v22 = vpop.permute.xlu0 %360 }
 0x106   : > { %502 = vst [vmem:[#allocation2 + $0x10] sm:$0xf0] %v496_v21  ;;  %v367_v23 = vsel %vm366_vm1, %v1242_v39, %v361_v22  ;;  %v368_v24 = vsel %vm366_vm1, %v361_v22, %v1246_v44  ;;  %v543_v25 = vld [vmem:[#allocation2 + $0x28] sm:$0xf] }
 0x107   : > { %373 = vst [vmem:[#allocation2 + $0x18] sm:$0xf] %v367_v23  ;;  %825 = vmatpush.msk.msra.mxu2 %vm553_vm8, %v543_v25  ;;  %v631_v21 = vld [vmem:[%s1185_s2] sm:$0xff]  ;;  %v651_v23 = vrot.slane %v636_v3, 4 }
 0x108   : > { %374 = vst [vmem:[#allocation2 + $0x50] sm:$0xf] %v368_v24 }
 0x109   : > { %615 = vmatpush.msra.mxu2 %v540_v27  ;;  %v652_v25 = vsel %vm553_vm8, %v635_v63, %v651_v23 }
 0x10b   : > { %616 = vmatpush.msra.mxu2 %v537_v28  ;;  %v385_v29 = vpop.permute.xlu1 %384 }
 0x10c   : > { %v393_v30 = vsel %vm392_vm2, %v385_v29, %v387_v6  ;;  %v538_v45 = vld [vmem:[#allocation2 + $0x20] sm:$0xff] }
 0x10d   : > { %399 = vst [vmem:[#allocation2 + $0x18] sm:$0xf0] %v393_v30  ;;  %617 = vmatpush.msra.mxu2 %v534_v31  ;;  %v539_v32 = vld [vmem:[#allocation2 + $0x10] sm:$0xff]  ;;  %v334_v40 = vpop.permute.xlu0 %333 }
 0x10e   : > { %595 = vmatpush.msra.mxu1 %v539_v32 }
 0x10f   : > { %618 = vmatpush.msra.mxu2 %v531_v34  ;;  %v533_v36 = vld [vmem:[#allocation2 + $0x50] sm:$0xff] }
 0x110   : > { %826 = vmatmul.msk.f32.vlgmr.msra.gmra.mxu2 %vm549_vm9, %v305_v33  ;;  %596 = vmatpush.msra.mxu1 %v536_v35 }
 0x112   : > { %597 = vmatpush.msra.mxu1 %v533_v36 }
 0x113   : > { %v512_v37 = vpop.permute.xlu1 %511 }
 0x114   : > { %v520_v39 = vsel %vm519_vm7, %v512_v37, %v1252_v2  ;;  %v532_v47 = vld [vmem:[#allocation2 + $0x18] sm:$0xff] }
 0x115   : > { %526 = vst [vmem:[#allocation2 + $0x60] sm:$0xf] %v520_v39  ;;  %v626_v52 = vpop.permute.xlu0 %625 }
 0x11b   : > { %v336_v41 = vpop.permute.xlu1 %335 }
 0x11c   : > { %v342_v42 = vsel %vm341_vm0, %v334_v40, %v336_v41  ;;  %v343_v43 = vsel %vm341_vm0, %v336_v41, %v1238_v38  ;;  %v541_v44 = vld [vmem:[#allocation2 + $0x60] sm:$0xf]  ;;  %v547_v38 = vpop.permute.xlu2 %546 }
 0x11d   : > { %348 = vst [vmem:[#allocation2 + $0x30] sm:$0xf0] %v342_v42  ;;  %821 = vmatpush.msk.msra.mxu0 %vm553_vm8, %v541_v44 }
 0x11e   : > { %349 = vst [vmem:[#allocation2] sm:$0xf0] %v343_v43 }
 0x11f   : > { %575 = vmatpush.msra.mxu0 %v538_v45 }
 0x121   : > { %576 = vmatpush.msra.mxu0 %v535_v46 }
 0x123   : > { %577 = vmatpush.msra.mxu0 %v532_v47 }
 0x124   : > { %v529_v48 = vld [vmem:[#allocation2 + $0x30] sm:$0xff] }
 0x125   : > { %578 = vmatpush.msra.mxu0 %v529_v48  ;;  %v530_v49 = vld [vmem:[#allocation2] sm:$0xff] }
 0x126   : > { %598 = vmatpush.msra.mxu1 %v530_v49  ;;  %822 = vmatmul.msk.f32.vlgmr.msra.gmra.mxu0 %vm549_vm9, %v305_v33 }
 0x127   : > { %824 = vmatmul.msk.f32.vlgmr.msra.gmra.mxu1 %vm549_vm9, %v305_v33 }
 0x193   : > { %v620_v51 = vpop.f32.mrf.mxu2 }
 0x194   : > { %v621_v53 = vadd.f32 %v620_v51, %v547_v38 }
 0x196   : > { %v630_v55 = vmul.f32 %v626_v52, %v621_v53 }
 0x198   : > { %v643_v56 = vmul.f32 %v637_v54, %v630_v55  ;;  %v650_v1 = vsub.f32 %v632_v59, %v630_v55 }
 0x19a   : > { %v658_v57 = vsub.f32 0.0, %v643_v56  ;;  %v655_v7 = vmul.f32 %v650_v1, %v637_v54 }
 0x19c   : > { %v663_v58 = vmul.f32 1.442695, %v658_v57 }
 0x19e   : > { %904 = vpow2.f32 %v663_v58 }
 0x1a3   : > { %v580_v60 = vpop.f32.mrf.mxu0 }
 0x1a4   : > { %v905_v61 = vpop.eup %904  ;;  %v581_v62 = vadd.f32 %v580_v60, %v547_v38  ;;  %v600_v0 = vpop.f32.mrf.mxu1 }
 0x1a5   : > { %670 = vst.sshfl [vmem:[#allocation1 + $0x10] sm:$0xff pattern:$0x75316420] %v905_v61  ;;  %v601_v2 = vadd.f32 %v600_v0, %v547_v38 }
 0x1a6   : > { %v628_v4 = vmul.f32 %v626_v52, %v581_v62 }
 0x1a7   : > { %v629_v5 = vmul.f32 %v626_v52, %v601_v2 }
 0x1a8   : > { %v641_v6 = vmul.f32 %v635_v63, %v628_v4 }
 0x1a9   : > { %v642_v8 = vmul.f32 %v636_v3, %v629_v5  ;;  %v646_v17 = vrot.slane %v629_v5, 4 }
 0x1aa   : > { %v656_v9 = vsub.f32 0.0, %v641_v6 }
 0x1ab   : > { %v657_v10 = vsub.f32 0.0, %v642_v8  ;;  %v647_v22 = vsel %vm553_vm8, %v628_v4, %v646_v17 }
 0x1ac   : > { %v674_v11 = vld [vmem:[#allocation1 + $0x11] ss:$2 sm:$0xff]  ;;  %v659_v12 = vmul.f32 1.442695, %v656_v9  ;;  %v649_v24 = vsub.f32 %v631_v21, %v647_v22 }
 0x1ad   : > { %v678_v13 = vmul.f32 %v674_v11, %v655_v7  ;;  %v661_v14 = vmul.f32 1.442695, %v657_v10 }
 0x1ae   : > { %906 = vpow2.f32 %v659_v12  ;;  %v654_v26 = vmul.f32 %v652_v25, %v649_v24 }
 0x1af   : > { %v680_v15 = vmul.f32 0.5, %v678_v13  ;;  %908 = vpow2.f32 %v661_v14 }
 0x1b1   : > { %v682_v16 = vmul.f32 %v680_v15, %v678_v13 }
 0x1b3   : > { %688 = vst [vmem:[#allocation1 + $0x11] ss:$2 sm:$0xff] %v682_v16 }
 0x1b4   : > { %v907_v19 = vpop.eup %906 }
 0x1b5   : > { %v909_v20 = vpop.eup %908  ;;  %668 = vst.sshfl [vmem:[#allocation1] sm:$0xff pattern:$0x75316420] %v907_v19 }
 0x1b6   : > { %669 = vst.sshfl [vmem:[#allocation1 + $0x8] sm:$0xff pattern:$0x75316420] %v909_v20 }
 0x1ba   : > { %v691_v31 = vld.sshfl [vmem:[#allocation1 + $0x10] sm:$0xff pattern:$0x75316420] }
 0x1bb   : > { %v697_v36 = vadd.f32 %v691_v31, %v643_v56 }
 0x1bd   : > { %v672_v27 = vld [vmem:[#allocation1 + $0x1] ss:$2 sm:$0xff] }
 0x1be   : > { %v677_v28 = vmul.f32 %v672_v27, %v654_v26 }
 0x1c0   : > { %v679_v29 = vmul.f32 0.5, %v677_v28 }
 0x1c2   : > { %v681_v30 = vmul.f32 %v679_v29, %v677_v28 }
 0x1c4   : > { %686 = vst [vmem:[#allocation1 + $0x1] ss:$2 sm:$0xff] %v681_v30 }
 0x1cb   : > { %v689_v32 = vld.sshfl [vmem:[#allocation1] sm:$0xff pattern:$0x75316420]  ;;  %v690_v33 = vld.sshfl [vmem:[#allocation1 + $0x8] sm:$0xff pattern:$0x75316420] }
 0x1cc   : > { %v695_v34 = vadd.f32 %v689_v32, %v641_v6  ;;  %v696_v35 = vadd.f32 %v690_v33, %v642_v8 }
 0x1ce   : > { %v699_v37 = vadd.f32 %v696_v35, %v695_v34 }
 0x1d0   : > { %v700_v39 = vadd.f32 %v699_v37, %v697_v36 }
 0x1d2   : > { %702 = vst [vmem:[%s1290_s27 - $0x4] sm:$0xf0] %v700_v39 }
 0x1d3   : > { %997 = shalt.err (!%p994_p12)
}
 0x1d4   : > { %841 = dma.vmem_to_hbm [thread:$0]  (%p1155_p7), %s717_s13, 128, %s719_s17, %s704_s19  }
 0x1d5 PF: > { %s730_s16 = sand.u32 1, %s1028_s21   ;;  %p1346_p13 = scmp.ge.s32.totalorder %s1040_s24, 2 }
 0x1d6   : > { %s731_s30 = scalar_lea.sflag [#allocation5], %s730_s16 }
 0x1d7   : > { %p852_p0 = pnand %p1346_p13, %p1123_p6 }
 0x1d9   : > { %p853_p3 = pneg %p852_p0 }
 0x1db   : > { %1023 = dma.done.wait (%p853_p3), %s731_s30, 128  }
 0x1dc   : > { %1025 = vsyncadd (%p853_p3), %s731_s30, 4294967168  ;;  %s1347_s7 = sld [smem:[#allocation12_spill]]  ;;  %p20_p5 = scmp.ge.s32.totalorder %s1141_s11, 4  }
 0x1dd   : > { %s1348_s21 = smov %s1032_s22  ;;  %s1349_s22 = smov %s1036_s23 }
 0x1de   : > { %s1351_s24 = smov %s1141_s11  ;;  %22 = sbr.rel (!%p20_p5) target bundleno = 8 (0x8), region = 113 }
 0x1e2   : > { %s1350_s23 = smov %s1347_s7 }
 0x1e3   :  { %737 = vsyncpa [#allocation4], 1 }
 0x1e4   :  { %739 = vsyncpa [#allocation4 + $0x1], 1 }
 0x1e5   :  { %740 = vsyncpa [#allocation7], 1 }
 0x1e6   :  { %741 = vsyncpa [#allocation5], 1 }
 0x1e7   :  { %743 = vsyncpa [#allocation5 + $0x1], 1 }

</bundles_post_ra>
